<compile_context>
chip_gen: v6e
topology: v6e:2x2x1
jax: 0.10.0
libtpu: 0.0.40
codegen_flags: <defaults>
</compile_context>

<pallas_src>
import functools

import jax
import jax.numpy as jnp
from jax.experimental import pallas as pl
from jax.experimental.pallas import tpu as pltpu


def _soft_target_ce_kernel(preds_ref, target_ref, out_ref, *, n_rows, tile_rows):
    i = pl.program_id(0)

    x = preds_ref[...].astype(jnp.float32)   # (TN, C)
    t = target_ref[...].astype(jnp.float32)  # (TN, C)

    # Stable log-softmax pieces without materializing log_probs.
    m = jnp.max(x, axis=-1, keepdims=True)                          # (TN, 1)
    lse = jnp.log(jnp.sum(jnp.exp(x - m), axis=-1, keepdims=True))  # (TN, 1)
    t_sum = jnp.sum(t, axis=-1, keepdims=True)                      # (TN, 1)
    tx_sum = jnp.sum(t * x, axis=-1, keepdims=True)                 # (TN, 1)
    per_row = (m + lse) * t_sum - tx_sum                            # (TN, 1)

    # Mask rows beyond the true batch (padded rows of the last tile).
    row_ids = i * tile_rows + jax.lax.broadcasted_iota(jnp.int32, per_row.shape, 0)
    per_row = jnp.where(row_ids < n_rows, per_row, 0.0)

    partial = jnp.sum(per_row)  # scalar partial sum for this tile

    # Lane-dense (8, 128) output block: partial at [0, 0], zeros elsewhere.
    sub = jax.lax.broadcasted_iota(jnp.int32, out_ref.shape, 0)
    lane = jax.lax.broadcasted_iota(jnp.int32, out_ref.shape, 1)
    out_ref[...] = jnp.where((sub == 0) & (lane == 0), partial, 0.0)


def _choose_tile_rows(n, c, itemsize=4, target_block_bytes=4 * 1024 * 1024):
    """Rows per tile: multiple of 8, ~target_block_bytes per input block."""
    rows = max(8, (target_block_bytes // max(1, c * itemsize)) // 8 * 8)
    if rows >= n:
        return n  # single full-batch tile; full-dim block is always legal
    return rows


def soft_target_cross_entropy(preds, target, *, tile_rows=None):
    """preds, target: arrays of shape (N, C). Returns scalar f32 loss."""
    assert preds.shape == target.shape and preds.ndim == 2
    N, C = preds.shape

    if tile_rows is None:
        tile_rows = _choose_tile_rows(N, C, itemsize=preds.dtype.itemsize)
    num_tiles = pl.cdiv(N, tile_rows)

    # VMEM budget: 2 inputs x 2 pipeline buffers x one block, plus slack.
    block_bytes = tile_rows * C * max(preds.dtype.itemsize, target.dtype.itemsize)
    vmem_limit = int(min(64 * 1024 * 1024,
                         max(2 * (4 * block_bytes), 16 * 1024 * 1024)))

    kernel = functools.partial(
        _soft_target_ce_kernel, n_rows=N, tile_rows=tile_rows)

    partials = pl.pallas_call(
        kernel,
        out_shape=jax.ShapeDtypeStruct((num_tiles * 8, 128), jnp.float32),
        grid=(num_tiles,),
        in_specs=[
            pl.BlockSpec((tile_rows, C), lambda i: (i, 0)),
            pl.BlockSpec((tile_rows, C), lambda i: (i, 0)),
        ],
        out_specs=pl.BlockSpec((8, 128), lambda i: (i, 0)),
        compiler_params=pltpu.CompilerParams(
            dimension_semantics=("parallel",),
            vmem_limit_bytes=vmem_limit,
        ),
    )(preds, target)

    # Tiny final reduce + mean in JAX (one nonzero element per tile block).
    return jnp.sum(partials) / jnp.float32(N)


def _reference(preds, target):
    logp = jax.nn.log_softmax(preds.astype(jnp.float32), axis=-1)
    return jnp.mean(jnp.sum(-target.astype(jnp.float32) * logp, axis=-1))


if __name__ == "__main__":
    key = jax.random.PRNGKey(0)
    k1, k2, k3, k4 = jax.random.split(key, 4)

    # Case 1: small, lane-aligned, single tile.
    preds1 = jax.random.normal(k1, (8, 128), dtype=jnp.float32)
    target1 = jax.nn.softmax(
        jax.random.normal(k2, (8, 128), dtype=jnp.float32), axis=-1)
    loss1 = jax.block_until_ready(soft_target_cross_entropy(preds1, target1))
    ref1 = _reference(preds1, target1)
    assert jnp.allclose(loss1, ref1, rtol=1e-5, atol=1e-5), (loss1, ref1)

    # Case 2: multi-tile with a ragged last tile (exercises remainder masking).
    preds2 = jax.random.normal(k3, (37, 256), dtype=jnp.float32)
    target2 = jax.nn.softmax(
        jax.random.normal(k4, (37, 256), dtype=jnp.float32), axis=-1)
    loss2 = jax.block_until_ready(
        soft_target_cross_entropy(preds2, target2, tile_rows=16))
    ref2 = _reference(preds2, target2)
    assert jnp.allclose(loss2, ref2, rtol=1e-5, atol=1e-5), (loss2, ref2)

    print("KERNEL_OK")
</pallas_src>

<mosaic_0001>
module attributes {stable_mosaic.version = 11 : i64} {
  func.func @_soft_target_ce_kernel(%arg0: i32, %arg1: memref<8x128xf32, #tpu.memory_space<vmem>>, %arg2: memref<8x128xf32, #tpu.memory_space<vmem>>, %arg3: memref<8x128xf32, #tpu.memory_space<vmem>>) attributes {dimension_semantics = [#tpu.dimension_semantics<parallel>], iteration_bounds = array<i64: 1>, scalar_prefetch = 0 : i64, scratch_operands = 0 : i64, tpu.core_type = #tpu.core_type<tc>, window_params = [{transform_indices = @transform_0, window_bounds = array<i64: 8, 128>}, {transform_indices = @transform_1, window_bounds = array<i64: 8, 128>}, {transform_indices = @transform_2, window_bounds = array<i64: 8, 128>}]} {
    %c0 = arith.constant 0 : index
    %c0_0 = arith.constant 0 : index
    %0 = vector.load %arg1[%c0, %c0_0] : memref<8x128xf32, #tpu.memory_space<vmem>>, vector<8x128xf32>
    %c0_1 = arith.constant 0 : index
    %c0_2 = arith.constant 0 : index
    %1 = vector.load %arg2[%c0_1, %c0_2] : memref<8x128xf32, #tpu.memory_space<vmem>>, vector<8x128xf32>
    %cst = arith.constant dense<0xFF800000> : vector<8xf32>
    %2 = vector.multi_reduction <maximumf>, %0, %cst [1] : vector<8x128xf32> to vector<8xf32>
    %3 = vector.shape_cast %2 : vector<8xf32> to vector<8x1xf32>
    %4 = vector.broadcast %3 : vector<8x1xf32> to vector<8x128xf32>
    %5 = arith.subf %0, %4 : vector<8x128xf32>
    %6 = math.exp %5 : vector<8x128xf32>
    %cst_3 = arith.constant dense<0.000000e+00> : vector<8xf32>
    %7 = vector.multi_reduction <add>, %6, %cst_3 [1] : vector<8x128xf32> to vector<8xf32>
    %8 = vector.shape_cast %7 : vector<8xf32> to vector<8x1xf32>
    %9 = math.log %8 : vector<8x1xf32>
    %cst_4 = arith.constant dense<0.000000e+00> : vector<8xf32>
    %10 = vector.multi_reduction <add>, %1, %cst_4 [1] : vector<8x128xf32> to vector<8xf32>
    %11 = vector.shape_cast %10 : vector<8xf32> to vector<8x1xf32>
    %12 = arith.mulf %1, %0 : vector<8x128xf32>
    %cst_5 = arith.constant dense<0.000000e+00> : vector<8xf32>
    %13 = vector.multi_reduction <add>, %12, %cst_5 [1] : vector<8x128xf32> to vector<8xf32>
    %14 = vector.shape_cast %13 : vector<8xf32> to vector<8x1xf32>
    %15 = arith.addf %3, %9 : vector<8x1xf32>
    %16 = arith.mulf %15, %11 : vector<8x1xf32>
    %17 = arith.subf %16, %14 : vector<8x1xf32>
    %c8_i32 = arith.constant 8 : i32
    %18 = arith.muli %arg0, %c8_i32 : i32
    %19 = tpu.iota {dimensions = array<i32: 0>} : vector<8x1xi32>
    %20 = vector.broadcast %18 : i32 to vector<8x1xi32>
    %21 = arith.addi %20, %19 : vector<8x1xi32>
    %c8_i32_6 = arith.constant 8 : i32
    %22 = vector.broadcast %c8_i32_6 : i32 to vector<8x1xi32>
    %23 = arith.cmpi slt, %21, %22 : vector<8x1xi32>
    %cst_7 = arith.constant 0.000000e+00 : f32
    %24 = vector.broadcast %cst_7 : f32 to vector<8x1xf32>
    %25 = arith.select %23, %17, %24 : vector<8x1xi1>, vector<8x1xf32>
    %26 = vector.shape_cast %25 : vector<8x1xf32> to vector<1x8x1xf32>
    %cst_8 = arith.constant dense<0.000000e+00> : vector<1xf32>
    %27 = vector.multi_reduction <add>, %26, %cst_8 [1, 2] : vector<1x8x1xf32> to vector<1xf32>
    %28 = vector.shape_cast %27 : vector<1xf32> to vector<1x1x1xf32>
    %29 = vector.extract %28[0, 0, 0] : f32 from vector<1x1x1xf32>
    %30 = tpu.iota {dimensions = array<i32: 0>} : vector<8x128xi32>
    %31 = tpu.iota {dimensions = array<i32: 1>} : vector<8x128xi32>
    %c0_i32 = arith.constant 0 : i32
    %32 = vector.broadcast %c0_i32 : i32 to vector<8x128xi32>
    %33 = arith.cmpi eq, %30, %32 : vector<8x128xi32>
    %c0_i32_9 = arith.constant 0 : i32
    %34 = vector.broadcast %c0_i32_9 : i32 to vector<8x128xi32>
    %35 = arith.cmpi eq, %31, %34 : vector<8x128xi32>
    %36 = arith.andi %33, %35 : vector<8x128xi1>
    %cst_10 = arith.constant 0.000000e+00 : f32
    %37 = vector.broadcast %29 : f32 to vector<8x128xf32>
    %38 = vector.broadcast %cst_10 : f32 to vector<8x128xf32>
    %39 = arith.select %36, %37, %38 : vector<8x128xi1>, vector<8x128xf32>
    %c0_11 = arith.constant 0 : index
    %c0_12 = arith.constant 0 : index
    %40 = vector.load %arg3[%c0_11, %c0_12] : memref<8x128xf32, #tpu.memory_space<vmem>>, vector<8x128xf32>
    tpu.vector_store %arg3[%c0_11, %c0_12], %39 {strides = array<i32>} : memref<8x128xf32, #tpu.memory_space<vmem>>, vector<8x128xf32>,
    return
  }
  func.func @transform_0(%arg0: i32) -> (i32, i32) {
    %c0_i32 = arith.constant 0 : i32
    %c0_i32_0 = arith.constant 0 : i32
    return %arg0, %c0_i32 : i32, i32
  }
  func.func @transform_1(%arg0: i32) -> (i32, i32) {
    %c0_i32 = arith.constant 0 : i32
    %c0_i32_0 = arith.constant 0 : i32
    return %arg0, %c0_i32 : i32, i32
  }
  func.func @transform_2(%arg0: i32) -> (i32, i32) {
    %c0_i32 = arith.constant 0 : i32
    %c0_i32_0 = arith.constant 0 : i32
    return %arg0, %c0_i32 : i32, i32
  }
}

</mosaic_0001>

<bundles_post_ra>
// kernel: tpu_custom_call.1
= control target key start
LH: loop header
LB: loop body
LE: loop exit
PB: predicated region body
PF: predicated region fallthrough
CT: control target
= control target key end

     0   :  { %7 = vsyncpa [#allocation3], 0  ;;  %s199_s0 = inlined_call_operand.hbm [shape: f32[8,128], index: 0, kind: input, shape index: {}]   ;;  %s200_s1 = inlined_call_operand.hbm [shape: f32[8,128], index: 1, kind: input, shape index: {}]   ;;  %s201_s2 = inlined_call_operand.hbm [shape: f32[8,128], index: 2, kind: output, shape index: {}]  }
   0x1   :  { %8 = vsyncpa [#allocation6], 0 }
   0x2   :  { %9 = vsyncpa [#allocation4], 0  ;;  %s172_s9 = smov [#allocation2]   ;;  %s173_s11 = smov [#allocation5]  }
   0x3   :  { %s16_s10 = sshll.u32 %s172_s9, 4  ;;  %s26_s12 = sshll.u32 %s173_s11, 4  ;;  %s17_s10 = int_to_ptr.vmem [resolvable:$true] %s16_s10  ;;  %s27_s12 = int_to_ptr.vmem [resolvable:$true] %s26_s12 }
   0x4   :  { %s114_s13 = scalar_lea.vmem %s17_s10, 128  ;;  %p119_p1 = scmp.lt.s32.totalorder %s17_s10, %s17_s10 }
   0x5   :  { %p115_p0 = scmp.ne.s32.totalorder %s17_s10, %s114_s13  ;;  %p120_p2 = scmp.lt.s32.totalorder %s114_s13, %s114_s13 }
   0x7   :  { %p121_p3 = por %p120_p2, %p119_p1 }
   0x9   :  { %p122_p4 = pnand %p121_p3, %p115_p0 }
   0xb   :  { %125 = shalt.err (!%p122_p4)
}
   0xc   :  { %19 = dma.hbm_to_vmem [thread:$0]  %s199_s0, 128, %s17_s10, [#allocation3]  }
   0xd   :  { %s134_s16 = scalar_lea.vmem %s27_s12, 128  ;;  %p139_p6 = scmp.lt.s32.totalorder %s27_s12, %s27_s12 }
   0xe   :  { %p135_p5 = scmp.ne.s32.totalorder %s27_s12, %s134_s16  ;;  %p140_p7 = scmp.lt.s32.totalorder %s134_s16, %s134_s16 }
  0x10   :  { %p141_p8 = por %p140_p7, %p139_p6 }
  0x12   :  { %p142_p9 = pnand %p141_p8, %p135_p5 }
  0x14   :  { %145 = shalt.err (!%p142_p9)
}
  0x15   :  { %29 = dma.hbm_to_vmem [thread:$0]  %s200_s1, 128, %s27_s12, [#allocation6]  }
  0x16   :  { %166 = dma.done.wait [#allocation3], 128  }
  0x17   :  { %167 = vsyncadd [#allocation3], 4294967168 }
  0x18   :  { %168 = dma.done.wait [#allocation6], 128  }
  0x19   :  { %169 = vsyncadd [#allocation6], 4294967168  ;;  %v36_v0 = vld [vmem:[#allocation2] sm:$0xff]  ;;  %v37_v1 = vld [vmem:[#allocation5] sm:$0xff]  ;;  %vm62_vm0 = vcmask 7168   ;;  %v56_v23 = vlaneseq  ;;  %s174_s0 = smov [#allocation7]  }
  0x1a   :  { %38 = vmax.xlane.f32.xlu0 %v36_v0  ;;  %47 = vadd.xlane.f32.xlu1 %v37_v1  ;;  %v49_v2 = vmul.f32 %v37_v1, %v36_v0  ;;  %s87_s1 = sshll.u32 %s174_s0, 4  ;;  %s88_s1 = int_to_ptr.vmem [resolvable:$true] %s87_s1 }
  0x1b   :  { %v57_v24 = vshrl.u32 %v56_v23, 7  ;;  %v74_v25 = vand.u32 127, %v56_v23  ;;  %s146_s20 = scalar_lea.vmem %s88_s1, 128  ;;  %p151_p11 = scmp.lt.s32.totalorder %s88_s1, %s88_s1 }
  0x1c   :  { %p147_p10 = scmp.ne.s32.totalorder %s88_s1, %s146_s20  ;;  %p152_p12 = scmp.lt.s32.totalorder %s146_s20, %s146_s20 }
  0x1d   :  { %vm75_vm1 = vcmp.eq.s32.totalorder %v57_v24, 0  ;;  %vm76_vm2 = vcmp.eq.s32.totalorder %v74_v25, 0 }
  0x1e   :  { %50 = vadd.xlane.f32.xlu1 %v49_v2  ;;  %vm77_vm3 = vmand %vm75_vm1, %vm76_vm2  ;;  %p153_p13 = por %p152_p12, %p151_p11 }
  0x20   :  { %p154_p0 = pnand %p153_p13, %p147_p10 }
  0xa3   :  { %v39_v3 = vpop.xlane.xlu0 %38  ;;  %v48_v8 = vpop.xlane.xlu1 %47 }
  0xa4   :  { %v40_v4 = vsub.f32 %v36_v0, %v39_v3 }
  0xa6   :  { %v41_v5 = vmul.f32 1.442695, %v40_v4 }
  0xa7   :  { %v51_v12 = vpop.xlane.xlu1 %50 }
  0xa8   :  { %102 = vpow2.f32 %v41_v5 }
  0xb5   :  { %v103_v6 = vpop.eup %102 }
  0xb6   :  { %43 = vadd.xlane.f32.xlu0 %v103_v6 }
 0x13f   :  { %v44_v7 = vpop.xlane.xlu0 %43 }
 0x140   :  { %104 = vlog2.f32 %v44_v7 }
 0x14d   :  { %v105_v9 = vpop.eup %104 }
 0x14e   :  { %v46_v10 = vmul.f32 0.6931472, %v105_v9 }
 0x150   :  { %v52_v11 = vadd.f32 %v46_v10, %v39_v3 }
 0x152   :  { %v53_v13 = vmul.f32 %v52_v11, %v48_v8 }
 0x154   :  { %v54_v14 = vsub.f32 %v53_v13, %v51_v12 }
 0x156   :  { %v63_v15 = vsel %vm62_vm0, %v54_v14, 0.0 }
 0x157   :  { %64 = vadd.xlane.f32.xlu0 %v63_v15 }
 0x1e0   :  { %v65_v16 = vpop.xlane.xlu0 %64 }
 0x1e1   :  { %v66_v17 = vrot.slane %v65_v16, 4 }
 0x1e3   :  { %v67_v18 = vadd.f32 %v66_v17, %v65_v16 }
 0x1e5   :  { %v68_v19 = vrot.slane %v67_v18, 2 }
 0x1e7   :  { %v69_v20 = vadd.f32 %v68_v19, %v67_v18 }
 0x1e9   :  { %v70_v21 = vrot.slane %v69_v20, 1 }
 0x1eb   :  { %v71_v22 = vadd.f32 %v70_v21, %v69_v20 }
 0x1ed   :  { %97 = vpush %v71_v22 }
 0x21e   :  { %s98_s19 = spop %97 }
 0x21f   :  { %v78_v26 = vstv %s98_s19 }
 0x220   :  { %v79_v27 = vsel %vm77_vm3, %v78_v26, 0.0 }
 0x221   :  { %80 = vst [vmem:[#allocation7] sm:$0xff] %v79_v27 }
 0x222   :  { %157 = shalt.err (!%p154_p0)
}
 0x223   :  { %90 = dma.vmem_to_hbm [thread:$0]  %s88_s1, 128, %s201_s2, [#allocation4]  }
 0x224   :  { %170 = dma.done.wait [#allocation4], 128  }
 0x225   :  { %171 = vsyncadd [#allocation4], 4294967168 }
 0x226   :  { %94 = vsyncpa [#allocation3], 1 }
 0x227   :  { %95 = vsyncpa [#allocation6], 1 }
 0x228   :  { %96 = vsyncpa [#allocation4], 1 }

</bundles_post_ra>
